<compile_context>
chip_gen: v5e
topology: v5e:2x2
jax: 0.10.0
libtpu: 0.0.40
codegen_flags: <defaults>
</compile_context>

<pallas_src>
import functools

import numpy as np
import jax
import jax.numpy as jnp
from jax.experimental import pallas as pl
from jax.experimental.pallas import tpu as pltpu

EPS = 1e-6
_VMEM_LIMIT = 32 * 1024 * 1024  # safe on v5e/v6e/v7x (<= scoped default or physical)


def _choose_n_tile(n, f, itemsize, target_bytes=2 * 1024 * 1024):
    """Largest divisor of n giving a (tile, f) f32/bf16 block <= target_bytes.

    Tile must be a multiple of 8 (sublane packing) unless it equals n.
    Keeps (in + out) x 2 double-buffers comfortably under the VMEM budget.
    """
    if n * f * itemsize <= target_bytes:
        return n
    t = n - (n % 8) if n % 8 == 0 else n
    t = n
    while t >= 8:
        if n % t == 0 and t % 8 == 0 and t * f * itemsize <= target_bytes:
            return t
    # TODO(synk): no aligned divisor found (e.g. prime C*T); fall back to full axis.
        t -= 1
    return n


# ---------------------------------------------------------------------------
# Kernel 1: per-(batch, freq) mean / std, single pass (sum + sum-of-squares),
# accumulated across C*T tiles directly in the resident output blocks.
# ---------------------------------------------------------------------------
def _stats_kernel(x_ref, mu_ref, sig_ref, *, n_total):
    # x_ref: (1, tn, F)   mu_ref / sig_ref: (1, 1, F), resident across the n axis
    n_idx = pl.program_id(1)
    x = x_ref[...].astype(jnp.float32)

    @pl.when(n_idx == 0)
    def _():
        mu_ref[...] = jnp.zeros_like(mu_ref)
        sig_ref[...] = jnp.zeros_like(sig_ref)

    # sublane accumulation (per-lane, no cross-lane reduce)
    mu_ref[...] += jnp.sum(x, axis=1, keepdims=True)
    sig_ref[...] += jnp.sum(x * x, axis=1, keepdims=True)

    @pl.when(n_idx == pl.num_programs(1) - 1)
    def _():
        s = mu_ref[...]
        ss = sig_ref[...]
        mean = s * (1.0 / n_total)
        # unbiased variance (torch.var default: divide by N-1)
        var = (ss - n_total * mean * mean) * (1.0 / (n_total - 1.0))
        mu_ref[...] = mean
        sig_ref[...] = jnp.sqrt(var + EPS)


def compute_freq_stats(x_r):
    """x_r: (B, N, F) with N = C*T.  Returns mu, sig each of shape (B, 1, F), f32."""
    B, N, F = x_r.shape
    tn = _choose_n_tile(N, F, x_r.dtype.itemsize)
    kernel = functools.partial(_stats_kernel, n_total=float(N))
    return pl.pallas_call(
        kernel,
        out_shape=(
            jax.ShapeDtypeStruct((B, 1, F), jnp.float32),
            jax.ShapeDtypeStruct((B, 1, F), jnp.float32),
        ),
        grid_spec=pltpu.PrefetchScalarGridSpec(
            num_scalar_prefetch=0,
            grid=(B, N // tn),
            in_specs=[pl.BlockSpec((1, tn, F), lambda b, n: (b, n, 0))],
            out_specs=[
                pl.BlockSpec((1, 1, F), lambda b, n: (b, 0, 0)),
                pl.BlockSpec((1, 1, F), lambda b, n: (b, 0, 0)),
            ],
        ),
        compiler_params=pltpu.CompilerParams(
            dimension_semantics=("parallel", "arbitrary"),
            vmem_limit_bytes=_VMEM_LIMIT,
        ),
    )(x_r)


# ---------------------------------------------------------------------------
# Kernel 2: fused affine mix  o = x * a + c   with per-(b, f) coefficients.
# ---------------------------------------------------------------------------
def _mix_kernel(x_ref, a_ref, c_ref, o_ref):
    # x_ref: (1, tn, F);  a_ref / c_ref: (1, 1, F) broadcast over sublanes
    o_ref[...] = (x_ref[...] * a_ref[...] + c_ref[...]).astype(o_ref.dtype)


def mix_affine(x_r, a, c):
    """x_r: (B, N, F); a, c: (B, 1, F) in x's dtype.  Returns x_r * a + c."""
    B, N, F = x_r.shape
    tn = _choose_n_tile(N, F, x_r.dtype.itemsize)
    return pl.pallas_call(
        _mix_kernel,
        out_shape=jax.ShapeDtypeStruct((B, N, F), x_r.dtype),
        grid_spec=pltpu.PrefetchScalarGridSpec(
            num_scalar_prefetch=0,
            grid=(B, N // tn),
            in_specs=[
                pl.BlockSpec((1, tn, F), lambda b, n: (b, n, 0)),
                pl.BlockSpec((1, 1, F), lambda b, n: (b, 0, 0)),
                pl.BlockSpec((1, 1, F), lambda b, n: (b, 0, 0)),
            ],
            out_specs=pl.BlockSpec((1, tn, F), lambda b, n: (b, n, 0)),
        ),
        compiler_params=pltpu.CompilerParams(
            dimension_semantics=("parallel", "parallel"),
            vmem_limit_bytes=_VMEM_LIMIT,
        ),
    )(x_r, a, c)


# ---------------------------------------------------------------------------
# Deterministic core (given lam and perm) and full forward with host randomness
# ---------------------------------------------------------------------------
def freq_mixstyle_apply(x, lam, perm):
    """x: (B, C, F, T); lam: python float; perm: (B,) int32 permutation."""
    B, C, F, T = x.shape
    N = C * T
    # lane-dense layout: F on lanes, reduction axis C*T on sublanes
    x_r = jnp.transpose(x, (0, 1, 3, 2)).reshape(B, N, F)

    mu, sig = compute_freq_stats(x_r)  # (B, 1, F) f32 each

    # Tiny per-(b, f) coefficient computation: plain jnp, negligible cost.
    lam = jnp.float32(lam)
    mu_p, sig_p = mu[perm], sig[perm]
    mu_mix = lam * mu + (1.0 - lam) * mu_p
    sig_mix = lam * sig + (1.0 - lam) * sig_p
    a = sig_mix / sig                  # F divides per batch, not C*F*T
    c = mu_mix - mu * a
    a = a.astype(x.dtype)
    c = c.astype(x.dtype)

    out_r = mix_affine(x_r, a, c)
    return out_r.reshape(B, C, T, F).transpose(0, 1, 3, 2)


def freq_mixstyle_forward(x, alpha=0.3, p=0.7, rng=None):
    """Full module forward: host randomness is glue, compute is Pallas."""
    rng = rng if rng is not None else np.random
    if rng.rand() > p:
        return x
    lam = rng.beta(alpha, alpha) if alpha > 0 else 1.0
    perm = jnp.asarray(rng.permutation(x.shape[0]), dtype=jnp.int32)
    return freq_mixstyle_apply(x, float(lam), perm)


# Pure-JAX reference (module semantics) for correctness checking.
def _reference(x, lam, perm):
    x = x.astype(jnp.float32)
    mu = jnp.mean(x, axis=(1, 3), keepdims=True)
    var = jnp.var(x, axis=(1, 3), keepdims=True, ddof=1)
    sig = jnp.sqrt(var + EPS)
    xn = (x - mu) / sig
    mu_mix = mu * lam + mu[perm] * (1.0 - lam)
    sig_mix = sig * lam + sig[perm] * (1.0 - lam)
    return xn * sig_mix + mu_mix


if __name__ == "__main__":
    # Deterministic inputs.
    key = jax.random.PRNGKey(0)
    B, C, F, T = 2, 4, 16, 16
    x = jax.random.normal(key, (B, C, F, T), dtype=jnp.float32)

    # Deterministic host randomness, mirroring the PyTorch module's np.random use.
    rng = np.random.RandomState(0)
    gate = rng.rand()           # 0.548 <= p=0.7 -> augmentation is applied
    lam = rng.beta(0.3, 0.3)
    perm_np = rng.permutation(B)
    perm = jnp.asarray(perm_np, dtype=jnp.int32)

    if gate > 0.7:
        out = x
    else:
        out = freq_mixstyle_apply(x, float(lam), perm)

    out = jax.block_until_ready(out)

    # Sanity check against a pure-JAX reference (sumsq-based variance gives a
    # tiny numeric drift vs the two-pass reference, hence 1e-4 tolerance).
    ref = _reference(x, float(lam), perm)
    assert out.shape == x.shape
    assert jnp.allclose(out, ref, atol=1e-4, rtol=1e-4), "mismatch vs reference"

    print("KERNEL_OK")
</pallas_src>

<mosaic_0001>
module attributes {stable_mosaic.version = 11 : i64} {
  func.func @_stats_kernel(%arg0: i32, %arg1: i32, %arg2: memref<1x64x16xf32, #tpu.memory_space<vmem>>, %arg3: memref<1x1x16xf32, #tpu.memory_space<vmem>>, %arg4: memref<1x1x16xf32, #tpu.memory_space<vmem>>) attributes {dimension_semantics = [#tpu.dimension_semantics<parallel>, #tpu.dimension_semantics<arbitrary>], iteration_bounds = array<i64: 2, 1>, scalar_prefetch = 0 : i64, scratch_operands = 0 : i64, tpu.core_type = #tpu.core_type<tc>, window_params = [{transform_indices = @transform_0, window_bounds = array<i64: 1, 64, 16>}, {transform_indices = @transform_1, window_bounds = array<i64: 1, 1, 16>}, {transform_indices = @transform_2, window_bounds = array<i64: 1, 1, 16>}]} {
    %c0 = arith.constant 0 : index
    %c0_0 = arith.constant 0 : index
    %c0_1 = arith.constant 0 : index
    %0 = vector.load %arg2[%c0, %c0_0, %c0_1] : memref<1x64x16xf32, #tpu.memory_space<vmem>>, vector<1x64x16xf32>
    %c0_i32 = arith.constant 0 : i32
    %1 = arith.cmpi eq, %arg1, %c0_i32 : i32
    %2 = arith.extui %1 : i1 to i32
    %c0_i32_2 = arith.constant 0 : i32
    %3 = arith.cmpi ne, %2, %c0_i32_2 : i32
    scf.if %3 {
      %cst_18 = arith.constant 0.000000e+00 : f32
      %18 = vector.broadcast %cst_18 : f32 to vector<1x1x16xf32>
      %c0_19 = arith.constant 0 : index
      %c0_20 = arith.constant 0 : index
      %c0_21 = arith.constant 0 : index
      %19 = vector.load %arg3[%c0_19, %c0_20, %c0_21] : memref<1x1x16xf32, #tpu.memory_space<vmem>>, vector<1x1x16xf32>
      tpu.vector_store %arg3[%c0_19, %c0_20, %c0_21], %18 {strides = array<i32>} : memref<1x1x16xf32, #tpu.memory_space<vmem>>, vector<1x1x16xf32>,
      %cst_22 = arith.constant 0.000000e+00 : f32
      %20 = vector.broadcast %cst_22 : f32 to vector<1x1x16xf32>
      %c0_23 = arith.constant 0 : index
      %c0_24 = arith.constant 0 : index
      %c0_25 = arith.constant 0 : index
      %21 = vector.load %arg4[%c0_23, %c0_24, %c0_25] : memref<1x1x16xf32, #tpu.memory_space<vmem>>, vector<1x1x16xf32>
      tpu.vector_store %arg4[%c0_23, %c0_24, %c0_25], %20 {strides = array<i32>} : memref<1x1x16xf32, #tpu.memory_space<vmem>>, vector<1x1x16xf32>,
    } else {
    }
    %c0_3 = arith.constant 0 : index
    %c0_4 = arith.constant 0 : index
    %c0_5 = arith.constant 0 : index
    %4 = vector.load %arg3[%c0_3, %c0_4, %c0_5] : memref<1x1x16xf32, #tpu.memory_space<vmem>>, vector<1x1x16xf32>
    %cst = arith.constant dense<0.000000e+00> : vector<1x16xf32>
    %5 = vector.multi_reduction <add>, %0, %cst [1] : vector<1x64x16xf32> to vector<1x16xf32>
    %6 = vector.shape_cast %5 : vector<1x16xf32> to vector<1x1x16xf32>
    %7 = arith.addf %4, %6 : vector<1x1x16xf32>
    %c0_6 = arith.constant 0 : index
    %c0_7 = arith.constant 0 : index
    %c0_8 = arith.constant 0 : index
    %8 = vector.load %arg3[%c0_6, %c0_7, %c0_8] : memref<1x1x16xf32, #tpu.memory_space<vmem>>, vector<1x1x16xf32>
    tpu.vector_store %arg3[%c0_6, %c0_7, %c0_8], %7 {strides = array<i32>} : memref<1x1x16xf32, #tpu.memory_space<vmem>>, vector<1x1x16xf32>,
    %c0_9 = arith.constant 0 : index
    %c0_10 = arith.constant 0 : index
    %c0_11 = arith.constant 0 : index
    %9 = vector.load %arg4[%c0_9, %c0_10, %c0_11] : memref<1x1x16xf32, #tpu.memory_space<vmem>>, vector<1x1x16xf32>
    %10 = arith.mulf %0, %0 : vector<1x64x16xf32>
    %cst_12 = arith.constant dense<0.000000e+00> : vector<1x16xf32>
    %11 = vector.multi_reduction <add>, %10, %cst_12 [1] : vector<1x64x16xf32> to vector<1x16xf32>
    %12 = vector.shape_cast %11 : vector<1x16xf32> to vector<1x1x16xf32>
    %13 = arith.addf %9, %12 : vector<1x1x16xf32>
    %c0_13 = arith.constant 0 : index
    %c0_14 = arith.constant 0 : index
    %c0_15 = arith.constant 0 : index
    %14 = vector.load %arg4[%c0_13, %c0_14, %c0_15] : memref<1x1x16xf32, #tpu.memory_space<vmem>>, vector<1x1x16xf32>
    tpu.vector_store %arg4[%c0_13, %c0_14, %c0_15], %13 {strides = array<i32>} : memref<1x1x16xf32, #tpu.memory_space<vmem>>, vector<1x1x16xf32>,
    %c0_i32_16 = arith.constant 0 : i32
    %15 = arith.cmpi eq, %arg1, %c0_i32_16 : i32
    %16 = arith.extui %15 : i1 to i32
    %c0_i32_17 = arith.constant 0 : i32
    %17 = arith.cmpi ne, %16, %c0_i32_17 : i32
    scf.if %17 {
      %c0_18 = arith.constant 0 : index
      %c0_19 = arith.constant 0 : index
      %c0_20 = arith.constant 0 : index
      %18 = vector.load %arg3[%c0_18, %c0_19, %c0_20] : memref<1x1x16xf32, #tpu.memory_space<vmem>>, vector<1x1x16xf32>
      %c0_21 = arith.constant 0 : index
      %c0_22 = arith.constant 0 : index
      %c0_23 = arith.constant 0 : index
      %19 = vector.load %arg4[%c0_21, %c0_22, %c0_23] : memref<1x1x16xf32, #tpu.memory_space<vmem>>, vector<1x1x16xf32>
      %cst_24 = arith.constant 1.562500e-02 : f32
      %20 = vector.broadcast %cst_24 : f32 to vector<1x1x16xf32>
      %21 = arith.mulf %18, %20 : vector<1x1x16xf32>
      %cst_25 = arith.constant 6.400000e+01 : f32
      %22 = vector.broadcast %cst_25 : f32 to vector<1x1x16xf32>
      %23 = arith.mulf %22, %21 : vector<1x1x16xf32>
      %24 = arith.mulf %23, %21 : vector<1x1x16xf32>
      %25 = arith.subf %19, %24 : vector<1x1x16xf32>
      %cst_26 = arith.constant 0.0158730168 : f32
      %26 = vector.broadcast %cst_26 : f32 to vector<1x1x16xf32>
      %27 = arith.mulf %25, %26 : vector<1x1x16xf32>
      %c0_27 = arith.constant 0 : index
      %c0_28 = arith.constant 0 : index
      %c0_29 = arith.constant 0 : index
      %28 = vector.load %arg3[%c0_27, %c0_28, %c0_29] : memref<1x1x16xf32, #tpu.memory_space<vmem>>, vector<1x1x16xf32>
      tpu.vector_store %arg3[%c0_27, %c0_28, %c0_29], %21 {strides = array<i32>} : memref<1x1x16xf32, #tpu.memory_space<vmem>>, vector<1x1x16xf32>,
      %cst_30 = arith.constant 9.99999997E-7 : f32
      %29 = vector.broadcast %cst_30 : f32 to vector<1x1x16xf32>
      %30 = arith.addf %27, %29 : vector<1x1x16xf32>
      %31 = math.sqrt %30 : vector<1x1x16xf32>
      %c0_31 = arith.constant 0 : index
      %c0_32 = arith.constant 0 : index
      %c0_33 = arith.constant 0 : index
      %32 = vector.load %arg4[%c0_31, %c0_32, %c0_33] : memref<1x1x16xf32, #tpu.memory_space<vmem>>, vector<1x1x16xf32>
      tpu.vector_store %arg4[%c0_31, %c0_32, %c0_33], %31 {strides = array<i32>} : memref<1x1x16xf32, #tpu.memory_space<vmem>>, vector<1x1x16xf32>,
    } else {
    }
    return
  }
  func.func @transform_0(%arg0: i32, %arg1: i32) -> (i32, i32, i32) {
    %c0_i32 = arith.constant 0 : i32
    %c0_i32_0 = arith.constant 0 : i32
    return %arg0, %arg1, %c0_i32 : i32, i32, i32
  }
  func.func @transform_1(%arg0: i32, %arg1: i32) -> (i32, i32, i32) {
    %c0_i32 = arith.constant 0 : i32
    %c0_i32_0 = arith.constant 0 : i32
    %c0_i32_1 = arith.constant 0 : i32
    return %arg0, %c0_i32, %c0_i32_0 : i32, i32, i32
  }
  func.func @transform_2(%arg0: i32, %arg1: i32) -> (i32, i32, i32) {
    %c0_i32 = arith.constant 0 : i32
    %c0_i32_0 = arith.constant 0 : i32
    %c0_i32_1 = arith.constant 0 : i32
    return %arg0, %c0_i32, %c0_i32_0 : i32, i32, i32
  }
}

</mosaic_0001>

<bundles_post_ra>
// kernel: tpu_custom_call.1
= control target key start
LH: loop header
LB: loop body
LE: loop exit
PB: predicated region body
PF: predicated region fallthrough
CT: control target
= control target key end

     0   :  { %8 = vsyncpa [#allocation3], 0  ;;  %s760_s0 = inlined_call_operand.vmem [shape: f32[2,64,16], index: 0, kind: input, shape index: {}]   ;;  %s761_s1 = inlined_call_operand.hbm [shape: f32[2,1,16], index: 1, kind: output, shape index: {0}]   ;;  %s762_s2 = inlined_call_operand.hbm [shape: f32[2,1,16], index: 2, kind: output, shape index: {1}]  }
   0x1   :  { %10 = vsyncpa [#allocation3 + $0x1], 0 }
   0x2   :  { %11 = vsyncpa [#allocation5], 0 }
   0x3   :  { %13 = vsyncpa [#allocation5 + $0x1], 0  ;;  %s605_s9 = smov 0   ;;  %s607_s10 = smov 0  }
   0x4   :  { %s609_s11 = smov 0   ;;  %s611_s12 = smov 0  }
   0x5   :  { %s613_s13 = smov 0   ;;  %s615_s14 = smov 0  }
   0x6 LB: > { %s404_s15 = sadd.s32 4294967295, %s587_s14   ;;  %s405_s16 = sadd.s32 4294967294, %s587_s14   ;;  %s587_s14 = sphi %s615_s14, %s19_s14   ;;  %s583_s13 = sphi %s613_s13, %s769_s13   ;;  %s579_s12 = sphi %s611_s12, %s768_s12   ;;  %s575_s11 = sphi %s609_s11, %s767_s11   ;;  %s571_s10 = sphi %s607_s10, %s766_s10   ;;  %s567_s9 = sphi %s605_s9, %s765_s9  }
   0x7   : > { %s31_s17 = sadd.s32 1, %s583_s13  ;;  %s66_s18 = sadd.s32 1, %s575_s11 }
   0x8   : > { %p33_p0 = scmp.ge.s32.totalorder %s31_s17, 2  ;;  %p76_p1 = scmp.ne.s32.totalorder %s575_s11, %s571_s10 }
   0x9   : > { %p77_p2 = scmp.eq.s32.totalorder %s404_s15, 1  ;;  %p82_p3 = scmp.ne.s32.totalorder %s571_s10, %s567_s9 }
   0xa   : > { %s771_s17 = smov (%p33_p0, %s31_s17), 0  ;;  %p83_p5 = scmp.eq.s32.totalorder %s405_s16, 1 }
   0xb   : > { %p645_p4 = por %p77_p2, %p76_p1  ;;  %s63_s20 = ssub.s32 %s583_s13, %s771_s17 }
   0xc   : > { %p408_p6 = scmp.ge.s32.totalorder %s587_s14, 1  ;;  %p64_p7 = scmp.eq.s32.totalorder %s63_s20, 0 }
   0xd   : > { %p652_p8 = por %p83_p5, %p82_p3  ;;  %p140_p9 = scmp.lt.s32.totalorder %s587_s14, 3 }
   0xe   : > { %s658_s22 = scalar_select %p64_p7, %s575_s11, %s66_s18  }
   0xf   : > { %p141_p10 = pnand %p408_p6, %p140_p9 }
  0x10   : > { %s661_s23 = sand.u32 (!%p141_p10), 1, %s571_s10   ;;  %p170_p11 = scmp.lt.s32.totalorder (!%p141_p10), %s579_s12, 1 }
  0x11   : > { %144 = sbr.rel (%p141_p10) target bundleno = 100 (0x64), region = 24  ;;  %s665_s24 = scalar_lea.vmem (!%p141_p10), [#allocation2], %s661_s23 }
  0x12   : > { %s671_s26 = scalar_lea.vmem (!%p141_p10), [#allocation4], %s661_s23  ;;  %s290_s5 = scalar_lea.hbm (!%p141_p10), %s761_s1, %s579_s12 }
  0x13   : > { %s292_s6 = sshll.u32 (!%p141_p10), %s665_s24, 4  ;;  %s294_s7 = sshll.u32 (!%p141_p10), %s290_s5, 4  ;;  %s293_s6 = int_to_ptr.vmem [resolvable:$true] %s292_s6  ;;  %s295_s7 = int_to_ptr.hbm [resolvable:$true] %s294_s7 }
  0x14   : > { %s278_s8 = scalar_lea.sflag (!%p141_p10), [#allocation3], %s661_s23  ;;  %s491_s15 = sshra.s32 (!%p141_p10), %s295_s7, 4  ;;  %s492_s15 = int_to_ptr.hbm [resolvable:$true] %s491_s15 }
  0x15   : > { %s493_s16 = scalar_lea.hbm (!%p141_p10), %s492_s15, 1  ;;  %p498_p1 = scmp.lt.s32.totalorder (!%p141_p10), %s492_s15, %s761_s1 }
  0x16   : > { %vm191_vm0 = vcmask 122880   ;;  %v589_v0 = vmov 0.0   ;;  %s171_s25 = scalar_select %p170_p11, %s579_s12, 1  ;;  %vm195_vm1 = vcmask 130048  }
  0x17   : > { %192 = vst.msk [vmem:[%s665_s24] sm:$0x1] %vm191_vm0, %v589_v0  ;;  %p494_p12 = scmp.ne.s32.totalorder %s492_s15, %s493_s16 }
  0x18   : > { %193 = vst.msk [vmem:[%s671_s26] sm:$0x1] %vm191_vm0, %v589_v0  ;;  %s413_s27 = sshll.u32 %s171_s25, 6  ;;  %s497_s25 = scalar_lea.hbm %s761_s1, 2 }
  0x19   : > { %s177_s30 = scalar_lea.vmem %s760_s0, %s413_s27  ;;  %p495_p13 = pnand %p494_p12, %p645_p4 }
  0x1a   : > { %v179_v1 = vld [vmem:[%s177_s30] sm:$0xff]  ;;  %v180_v2 = vld [vmem:[%s177_s30 + $0x8] sm:$0xff]  ;;  %v181_v3 = vld [vmem:[%s177_s30 + $0x10] sm:$0xff]  ;;  %p499_p2 = scmp.lt.s32.totalorder %s497_s25, %s493_s16 }
  0x1b   : > { %v182_v4 = vld [vmem:[%s177_s30 + $0x18] sm:$0xff]  ;;  %v196_v5 = vsel %vm195_vm1, %v179_v1, 0.0  ;;  %v197_v6 = vsel %vm195_vm1, %v180_v2, 0.0  ;;  %v199_v7 = vsel %vm195_vm1, %v181_v3, 0.0  ;;  %v221_v8 = vmul.f32 %v179_v1, %v179_v1  ;;  %v183_v9 = vld [vmem:[%s177_s30 + $0x20] sm:$0xff]  ;;  %v184_v14 = vld [vmem:[%s177_s30 + $0x28] sm:$0xff]  ;;  %p496_p0 = pneg %p495_p13 }
  0x1c   : > { %v198_v10 = vadd.f32 %v197_v6, %v196_v5  ;;  %v201_v11 = vsel %vm195_vm1, %v182_v4, 0.0  ;;  %v222_v12 = vmul.f32 %v180_v2, %v180_v2  ;;  %v223_v13 = vmul.f32 %v181_v3, %v181_v3  ;;  %v185_v21 = vld [vmem:[%s177_s30 + $0x30] sm:$0xff]  ;;  %v186_v28 = vld [vmem:[%s177_s30 + $0x38] sm:$0xff]  ;;  %p500_p3 = por %p499_p2, %p498_p1 }
  0x1d   : > { %v224_v16 = vmul.f32 %v182_v4, %v182_v4  ;;  %v203_v17 = vsel %vm195_vm1, %v183_v9, 0.0  ;;  %v225_v18 = vmul.f32 %v183_v9, %v183_v9  ;;  %v229_v19 = vsel %vm195_vm1, %v221_v8, 0.0 }
  0x1e   : > { %v200_v15 = vadd.f32 %v199_v7, %v198_v10  ;;  %v230_v20 = vsel %vm195_vm1, %v222_v12, 0.0  ;;  %v232_v24 = vsel %vm195_vm1, %v223_v13, 0.0  ;;  %v205_v25 = vsel %vm195_vm1, %v184_v14, 0.0  ;;  %v194_v55 = vld [vmem:[%s665_s24] sm:$0x1]  ;;  %p501_p5 = pnand %p500_p3, %p496_p0 }
  0x1f   : > { %v231_v23 = vadd.f32 %v230_v20, %v229_v19  ;;  %v226_v26 = vmul.f32 %v184_v14, %v184_v14  ;;  %v234_v27 = vsel %vm195_vm1, %v224_v16, 0.0  ;;  %v207_v31 = vsel %vm195_vm1, %v185_v21, 0.0  ;;  %v220_v60 = vld [vmem:[%s671_s26] sm:$0x1] }
  0x20   : > { %v202_v22 = vadd.f32 %v201_v11, %v200_v15  ;;  %v227_v32 = vmul.f32 %v185_v21, %v185_v21  ;;  %v236_v33 = vsel %vm195_vm1, %v225_v18, 0.0  ;;  %v209_v36 = vsel %vm195_vm1, %v186_v28, 0.0 }
  0x21   : > { %v233_v30 = vadd.f32 %v232_v24, %v231_v23  ;;  %v228_v37 = vmul.f32 %v186_v28, %v186_v28  ;;  %v238_v38 = vsel %vm195_vm1, %v226_v26, 0.0 }
  0x22   : > { %v204_v29 = vadd.f32 %v203_v17, %v202_v22  ;;  %v240_v41 = vsel %vm195_vm1, %v227_v32, 0.0 }
  0x23   : > { %v235_v35 = vadd.f32 %v234_v27, %v233_v30  ;;  %v242_v44 = vsel %vm195_vm1, %v228_v37, 0.0 }
  0x24   : > { %v206_v34 = vadd.f32 %v205_v25, %v204_v29 }
  0x25   : > { %v237_v40 = vadd.f32 %v236_v33, %v235_v35 }
  0x26   : > { %v208_v39 = vadd.f32 %v207_v31, %v206_v34 }
  0x27   : > { %v239_v43 = vadd.f32 %v238_v38, %v237_v40 }
  0x28   : > { %v210_v42 = vadd.f32 %v209_v36, %v208_v39 }
  0x29   : > { %v241_v46 = vadd.f32 %v240_v41, %v239_v43 }
  0x2a   : > { %v211_v45 = vrot.slane %v210_v42, 4 }
  0x2b   : > { %v243_v48 = vadd.f32 %v242_v44, %v241_v46 }
  0x2c   : > { %v212_v47 = vadd.f32 %v211_v45, %v210_v42 }
  0x2d   : > { %v244_v50 = vrot.slane %v243_v48, 4 }
  0x2e   : > { %v213_v49 = vrot.slane %v212_v47, 2 }
  0x2f   : > { %v245_v52 = vadd.f32 %v244_v50, %v243_v48 }
  0x30   : > { %v214_v51 = vadd.f32 %v213_v49, %v212_v47 }
  0x31   : > { %v246_v54 = vrot.slane %v245_v52, 2 }
  0x32   : > { %v215_v53 = vrot.slane %v214_v51, 1 }
  0x33   : > { %v247_v57 = vadd.f32 %v246_v54, %v245_v52 }
  0x34   : > { %v216_v56 = vadd.f32 %v215_v53, %v214_v51 }
  0x35   : > { %v248_v59 = vrot.slane %v247_v57, 1 }
  0x36   : > { %v217_v58 = vadd.f32 %v216_v56, %v194_v55 }
  0x37   : > { %v249_v61 = vadd.f32 %v248_v59, %v247_v57 }
  0x38   : > { %219 = vst.msk [vmem:[%s665_s24] sm:$0x1] %vm191_vm0, %v217_v58 }
  0x39   : > { %v250_v62 = vadd.f32 %v249_v61, %v220_v60 }
  0x3b   : > { %251 = vst.msk [vmem:[%s671_s26] sm:$0x1] %vm191_vm0, %v250_v62 }
  0x3f   : > { %v255_v63 = vld [vmem:[%s665_s24] sm:$0x1] }
  0x40   : > { %v257_v0 = vmul.f32 0.015625, %v255_v63 }
  0x42   : > { %262 = vst.msk [vmem:[%s665_s24] sm:$0x1] %vm191_vm0, %v257_v0  ;;  %v258_v1 = vmul.f32 64.0, %v257_v0  ;;  %v256_v2 = vld [vmem:[%s671_s26] sm:$0x1] }
  0x43   : > { %504 = shalt.err (!%p501_p5)
}
  0x44   : > { %414 = dma.vmem_to_hbm [thread:$0]  (%p645_p4), %s293_s6, 16, %s295_s7, %s278_s8   ;;  %v259_v3 = vmul.f32 %v258_v1, %v257_v0 }
  0x45   : > { %s303_s30 = scalar_lea.hbm %s762_s2, %s579_s12  ;;  %s305_s3 = sshll.u32 %s671_s26, 4  ;;  %s306_s3 = int_to_ptr.vmem [resolvable:$true] %s305_s3 }
  0x46   : > { %v260_v4 = vsub.f32 %v256_v2, %v259_v3  ;;  %s307_s4 = sshll.u32 %s303_s30, 4  ;;  %s282_s5 = scalar_lea.sflag [#allocation5], %s661_s23  ;;  %s308_s4 = int_to_ptr.hbm [resolvable:$true] %s307_s4 }
  0x47   : > { %s519_s6 = sshra.s32 %s308_s4, 4  ;;  %s525_s15 = scalar_lea.hbm %s762_s2, 2  ;;  %s520_s6 = int_to_ptr.hbm [resolvable:$true] %s519_s6 }
  0x48   : > { %v261_v5 = vmul.f32 0.015873017, %v260_v4  ;;  %s521_s7 = scalar_lea.hbm %s520_s6, 1  ;;  %p526_p10 = scmp.lt.s32.totalorder %s520_s6, %s762_s2 }
  0x49   : > { %p522_p6 = scmp.ne.s32.totalorder %s520_s6, %s521_s7  ;;  %p527_p11 = scmp.lt.s32.totalorder %s525_s15, %s521_s7 }
  0x4a   : > { %v263_v6 = vadd.f32 1e-06, %v261_v5 }
  0x4b   : > { %p523_p7 = pnand %p522_p6, %p645_p4  ;;  %p528_p12 = por %p527_p11, %p526_p10 }
  0x4c   : > { %475 = vrsqrt.f32 %v263_v6  ;;  %vm271_vm2 = vcmp.eq.f32.partialorder %v263_v6, inf  ;;  %v274_v14 = vand.u32 2147483648, %v263_v6  ;;  %vm273_vm3 = vcmp.eq.f32.partialorder %v263_v6, 0.0 }
  0x4d   : > { %p524_p9 = pneg %p523_p7 }
  0x4f   : > { %p529_p13 = pnand %p528_p12, %p524_p9 }
  0x52   : > { %v476_v7 = vpop.eup %475 }
  0x53   : > { %v265_v8 = vmul.f32 %v476_v7, %v263_v6 }
  0x55   : > { %v266_v9 = vmul.f32 %v476_v7, %v265_v8 }
  0x57   : > { %v267_v10 = vmul.f32 0.5, %v266_v9 }
  0x59   : > { %v268_v11 = vsub.f32 1.5, %v267_v10 }
  0x5b   : > { %v269_v12 = vmul.f32 %v476_v7, %v268_v11 }
  0x5d   : > { %v270_v13 = vmul.f32 %v269_v12, %v263_v6 }
  0x5f   : > { %v272_v15 = vsel %vm271_vm2, %v263_v6, %v270_v13 }
  0x60   : > { %v275_v16 = vsel %vm273_vm3, %v274_v14, %v272_v15 }
  0x61   : > { %276 = vst.msk [vmem:[%s671_s26] sm:$0x1] %vm191_vm0, %v275_v16 }
  0x62   : > { %532 = shalt.err (!%p529_p13)
}
  0x63   : > { %415 = dma.vmem_to_hbm [thread:$0]  (%p645_p4), %s306_s3, 16, %s308_s4, %s282_s5  }
  0x64 PF: > { %p425_p0 = scmp.ge.s32.totalorder %s587_s14, 2  ;;  %s319_s23 = sand.u32 1, %s567_s9  }
  0x65   : > { %s320_s26 = scalar_lea.sflag [#allocation3], %s319_s23 }
  0x66   : > { %p419_p1 = pnand %p425_p0, %p652_p8 }
  0x68   : > { %p420_p2 = pneg %p419_p1 }
  0x6a   : > { %558 = dma.done.wait (%p420_p2), %s320_s26, 16  }
  0x6b   : > { %560 = vsyncadd (%p420_p2), %s320_s26, 4294967280  ;;  %s329_s20 = scalar_lea.sflag [#allocation5], %s319_s23 }
  0x6c   : > { %562 = dma.done.wait (%p420_p2), %s329_s20, 16  }
  0x6d   : > { %564 = vsyncadd (%p420_p2), %s329_s20, 4294967280  ;;  %s19_s14 = sadd.s32 1, %s587_s14   ;;  %s765_s9 = smov %s571_s10 }
  0x6e   : > { %p16_p3 = scmp.ge.s32.totalorder %s19_s14, 4   ;;  %s766_s10 = smov %s575_s11 }
  0x6f   : > { %s767_s11 = smov %s658_s22  ;;  %s768_s12 = smov %s583_s13 }
  0x70   : > { %s769_s13 = smov %s771_s17  ;;  %18 = sbr.rel (!%p16_p3) target bundleno = 6 (0x6), region = 84 }
  0x75   :  { %334 = vsyncpa [#allocation3], 1 }
  0x76   :  { %336 = vsyncpa [#allocation3 + $0x1], 1 }
  0x77   :  { %337 = vsyncpa [#allocation5], 1 }
  0x78   :  { %339 = vsyncpa [#allocation5 + $0x1], 1 }

</bundles_post_ra>
